<compile_context>
chip_gen: v5e
topology: v5e:2x2
jax: 0.10.0
libtpu: 0.0.40
codegen_flags: <defaults>
</compile_context>

<pallas_src>
import functools

import jax
import jax.numpy as jnp
from jax.experimental import pallas as pl
from jax.experimental.pallas import tpu as pltpu


def phinet_kernel(x_ref, w1_ref, b1_ref, w2_ref, b2_ref, o_ref, *, compute_dtype):
    # Fused Linear -> ReLU -> Linear on one batch tile; f32 accumulate on MXU.
    x = x_ref[...].astype(compute_dtype)
    h = jnp.dot(x, w1_ref[...].astype(compute_dtype),
                preferred_element_type=jnp.float32)
    h = jnp.maximum(h + b1_ref[...], 0.0)
    y = jnp.dot(h.astype(compute_dtype), w2_ref[...].astype(compute_dtype),
                preferred_element_type=jnp.float32)
    o_ref[...] = (y + b2_ref[...]).astype(o_ref.dtype)


def _round_up(n, m):
    return ((n + m - 1) // m) * m


def prepare_phinet_params(w1, b1, w2, b2):
    """One-time parameter prep (hoisted out of the per-call path).

    Takes PyTorch nn.Linear layout (out, in) weights and 1-D biases, returns
    (W1^T, b1[1,:], W2^T, b2[1,:]) ready for the kernel.  Call once per set of
    parameters, NOT per forward call.
    """
    w1_t = jnp.asarray(w1).T               # (input_dim, hidden)
    b1_r = jnp.asarray(b1).reshape(1, -1)  # (1, hidden)
    w2_t = jnp.asarray(w2).T               # (hidden, output_dim)
    b2_r = jnp.asarray(b2).reshape(1, -1)  # (1, output_dim)
    return w1_t, b1_r, w2_t, b2_r


def phinet_forward(x, prepared_params, *, use_bf16=False, max_tile_b=8192):
    """Forward pass of PhiNet.

    x               : (B, input_dim) float32
    prepared_params : output of prepare_phinet_params()
    Returns (B, output_dim) float32.
    """
    w1_t, b1_r, w2_t, b2_r = prepared_params
    B, input_dim = x.shape
    hidden = w1_t.shape[1]
    output_dim = w2_t.shape[1]
    assert w1_t.shape[0] == input_dim and w2_t.shape[0] == hidden

    SUBLANE = 8
    B_p = _round_up(B, SUBLANE)

    # Number of batch tiles: enough to keep each tile <= max_tile_b rows, and
    # at least 2 for large batches so the parallel grid axis can shard across
    # v7x's two TensorCores (harmless on single-TC v5e/v6e).
    n_tiles = pl.cdiv(B_p, max_tile_b)
    if B_p >= 2048 and n_tiles < 2:
        n_tiles = 2
    tile_b = _round_up(pl.cdiv(B_p, n_tiles), SUBLANE)
    grid_b = pl.cdiv(B_p, tile_b)
    B_final = grid_b * tile_b  # at most a few padded rows beyond B_p

    # Pad batch rows only when needed (demo batch of 16 takes the no-copy path).
    if B_final != B:
        x_in = jnp.zeros((B_final, input_dim), x.dtype).at[:B, :].set(x)
    else:
        x_in = x

    compute_dtype = jnp.bfloat16 if use_bf16 else jnp.float32
    kernel = functools.partial(phinet_kernel, compute_dtype=compute_dtype)

    y = pl.pallas_call(
        kernel,
        out_shape=jax.ShapeDtypeStruct((B_final, output_dim), x.dtype),
        grid_spec=pltpu.PrefetchScalarGridSpec(
            num_scalar_prefetch=0,
            grid=(grid_b,),
            in_specs=[
                # x: tiled over batch; last dim == full array dim (no lane pad in HBM).
                pl.BlockSpec((tile_b, input_dim), lambda i: (i, 0)),
                # Weights / biases: full arrays, resident (constant index maps).
                pl.BlockSpec((input_dim, hidden), lambda i: (0, 0)),
                pl.BlockSpec((1, hidden), lambda i: (0, 0)),
                pl.BlockSpec((hidden, output_dim), lambda i: (0, 0)),
                pl.BlockSpec((1, output_dim), lambda i: (0, 0)),
            ],
            out_specs=pl.BlockSpec((tile_b, output_dim), lambda i: (i, 0)),
        ),
        compiler_params=pltpu.CompilerParams(
            dimension_semantics=("parallel",),
        ),
    )(x_in, w1_t, b1_r, w2_t, b2_r)

    return y[:B] if B_final != B else y


def init_phinet_params(key, input_dim, output_dim, hidden_dim=64):
    """Deterministic init mimicking PyTorch nn.Linear defaults:
    W, b ~ U(-1/sqrt(fan_in), 1/sqrt(fan_in)); PyTorch (out, in) layout."""
    k1, k2, k3, k4 = jax.random.split(key, 4)
    bound1 = 1.0 / jnp.sqrt(jnp.float32(input_dim))
    bound2 = 1.0 / jnp.sqrt(jnp.float32(hidden_dim))
    w1 = jax.random.uniform(k1, (hidden_dim, input_dim), jnp.float32, -bound1, bound1)
    b1 = jax.random.uniform(k2, (hidden_dim,), jnp.float32, -bound1, bound1)
    w2 = jax.random.uniform(k3, (output_dim, hidden_dim), jnp.float32, -bound2, bound2)
    b2 = jax.random.uniform(k4, (output_dim,), jnp.float32, -bound2, bound2)
    return w1, b1, w2, b2


if __name__ == "__main__":
    # Shapes consistent with the module: batch=16, input_dim=32,
    # hidden_dim=64 (module default), output_dim=8.
    B, input_dim, hidden_dim, output_dim = 16, 32, 64, 8

    key = jax.random.PRNGKey(0)
    kx, kp = jax.random.split(key)
    x = jax.random.normal(kx, (B, input_dim), jnp.float32)
    w1, b1, w2, b2 = init_phinet_params(kp, input_dim, output_dim, hidden_dim)

    # Parameter prep is done ONCE, outside the per-call path.
    params = prepare_phinet_params(w1, b1, w2, b2)

    # f32 compute for the demo so it matches the reference to 1e-5;
    # set use_bf16=True for throughput runs on v6e/v7x (looser tolerance).
    out = phinet_forward(x, params, use_bf16=False)
    out = jax.block_until_ready(out)

    # Pure-JAX reference (same semantics as the PyTorch forward).
    ref = jnp.maximum(x @ w1.T + b1, 0.0) @ w2.T + b2
    assert out.shape == (B, output_dim)
    assert jnp.allclose(out, ref, atol=1e-5, rtol=1e-5)

    print("KERNEL_OK")
</pallas_src>

<mosaic_0001>
module attributes {stable_mosaic.version = 11 : i64} {
  func.func @phinet_kernel(%arg0: i32, %arg1: memref<16x32xf32, #tpu.memory_space<vmem>>, %arg2: memref<32x64xf32, #tpu.memory_space<vmem>>, %arg3: memref<1x64xf32, #tpu.memory_space<vmem>>, %arg4: memref<64x8xf32, #tpu.memory_space<vmem>>, %arg5: memref<1x8xf32, #tpu.memory_space<vmem>>, %arg6: memref<16x8xf32, #tpu.memory_space<vmem>>) attributes {dimension_semantics = [#tpu.dimension_semantics<parallel>], iteration_bounds = array<i64: 1>, scalar_prefetch = 0 : i64, scratch_operands = 0 : i64, tpu.core_type = #tpu.core_type<tc>, window_params = [{transform_indices = @transform_0, window_bounds = array<i64: 16, 32>}, {pipeline_mode = #tpu.pipeline_mode<synchronous>, transform_indices = @transform_1, window_bounds = array<i64: 32, 64>}, {pipeline_mode = #tpu.pipeline_mode<synchronous>, transform_indices = @transform_2, window_bounds = array<i64: 1, 64>}, {pipeline_mode = #tpu.pipeline_mode<synchronous>, transform_indices = @transform_3, window_bounds = array<i64: 64, 8>}, {pipeline_mode = #tpu.pipeline_mode<synchronous>, transform_indices = @transform_4, window_bounds = array<i64: 1, 8>}, {transform_indices = @transform_5, window_bounds = array<i64: 16, 8>}]} {
    %c0 = arith.constant 0 : index
    %c0_0 = arith.constant 0 : index
    %0 = vector.load %arg1[%c0, %c0_0] : memref<16x32xf32, #tpu.memory_space<vmem>>, vector<16x32xf32>
    %c0_1 = arith.constant 0 : index
    %c0_2 = arith.constant 0 : index
    %1 = vector.load %arg2[%c0_1, %c0_2] : memref<32x64xf32, #tpu.memory_space<vmem>>, vector<32x64xf32>
    %cst = arith.constant dense<0.000000e+00> : vector<16x64xf32>
    %2 = tpu.matmul %0, %1, %cst {dimension_numbers = #tpu.dot_dimension_numbers<[1], [0], [0], [1], [0, 0, 1, 1], [], []>} : vector<16x32xf32>, vector<32x64xf32>, vector<16x64xf32> -> vector<16x64xf32>
    %c0_3 = arith.constant 0 : index
    %c0_4 = arith.constant 0 : index
    %3 = vector.load %arg3[%c0_3, %c0_4] : memref<1x64xf32, #tpu.memory_space<vmem>>, vector<1x64xf32>
    %4 = vector.broadcast %3 : vector<1x64xf32> to vector<16x64xf32>
    %5 = arith.addf %2, %4 : vector<16x64xf32>
    %cst_5 = arith.constant 0.000000e+00 : f32
    %6 = vector.broadcast %cst_5 : f32 to vector<16x64xf32>
    %7 = arith.maximumf %5, %6 : vector<16x64xf32>
    %c0_6 = arith.constant 0 : index
    %c0_7 = arith.constant 0 : index
    %8 = vector.load %arg4[%c0_6, %c0_7] : memref<64x8xf32, #tpu.memory_space<vmem>>, vector<64x8xf32>
    %cst_8 = arith.constant dense<0.000000e+00> : vector<16x8xf32>
    %9 = tpu.matmul %7, %8, %cst_8 {dimension_numbers = #tpu.dot_dimension_numbers<[1], [0], [0], [1], [0, 0, 1, 1], [], []>} : vector<16x64xf32>, vector<64x8xf32>, vector<16x8xf32> -> vector<16x8xf32>
    %c0_9 = arith.constant 0 : index
    %c0_10 = arith.constant 0 : index
    %10 = vector.load %arg5[%c0_9, %c0_10] : memref<1x8xf32, #tpu.memory_space<vmem>>, vector<1x8xf32>
    %11 = vector.broadcast %10 : vector<1x8xf32> to vector<16x8xf32>
    %12 = arith.addf %9, %11 : vector<16x8xf32>
    %c0_11 = arith.constant 0 : index
    %c0_12 = arith.constant 0 : index
    %13 = vector.load %arg6[%c0_11, %c0_12] : memref<16x8xf32, #tpu.memory_space<vmem>>, vector<16x8xf32>
    tpu.vector_store %arg6[%c0_11, %c0_12], %12 {strides = array<i32>} : memref<16x8xf32, #tpu.memory_space<vmem>>, vector<16x8xf32>,
    return
  }
  func.func @transform_0(%arg0: i32) -> (i32, i32) {
    %c0_i32 = arith.constant 0 : i32
    %c0_i32_0 = arith.constant 0 : i32
    return %arg0, %c0_i32 : i32, i32
  }
  func.func @transform_1(%arg0: i32) -> (i32, i32) {
    %c0_i32 = arith.constant 0 : i32
    %c0_i32_0 = arith.constant 0 : i32
    %c0_i32_1 = arith.constant 0 : i32
    return %c0_i32, %c0_i32_0 : i32, i32
  }
  func.func @transform_2(%arg0: i32) -> (i32, i32) {
    %c0_i32 = arith.constant 0 : i32
    %c0_i32_0 = arith.constant 0 : i32
    %c0_i32_1 = arith.constant 0 : i32
    return %c0_i32, %c0_i32_0 : i32, i32
  }
  func.func @transform_3(%arg0: i32) -> (i32, i32) {
    %c0_i32 = arith.constant 0 : i32
    %c0_i32_0 = arith.constant 0 : i32
    %c0_i32_1 = arith.constant 0 : i32
    return %c0_i32, %c0_i32_0 : i32, i32
  }
  func.func @transform_4(%arg0: i32) -> (i32, i32) {
    %c0_i32 = arith.constant 0 : i32
    %c0_i32_0 = arith.constant 0 : i32
    %c0_i32_1 = arith.constant 0 : i32
    return %c0_i32, %c0_i32_0 : i32, i32
  }
  func.func @transform_5(%arg0: i32) -> (i32, i32) {
    %c0_i32 = arith.constant 0 : i32
    %c0_i32_0 = arith.constant 0 : i32
    return %arg0, %c0_i32 : i32, i32
  }
}

</mosaic_0001>

<bundles_post_ra>
// kernel: tpu_custom_call.1
= control target key start
LH: loop header
LB: loop body
LE: loop exit
PB: predicated region body
PF: predicated region fallthrough
CT: control target
= control target key end

     0   :  { %vm30_vm0 = vcmask 261120   ;;  %vm74_vm1 = vcmask 523264   ;;  %vm104_vm2 = vcmask 64512   ;;  %s213_s1 = inlined_call_operand.vmem [shape: f32[32,64], index: 1, kind: input, shape index: {}]   ;;  %s214_s3 = inlined_call_operand.vmem [shape: f32[64,8], index: 3, kind: input, shape index: {}]   ;;  %s215_s0 = inlined_call_operand.vmem [shape: f32[16,32], index: 0, kind: input, shape index: {}]   ;;  %s216_s2 = inlined_call_operand.vmem [shape: f32[1,64], index: 2, kind: input, shape index: {}]   ;;  %s217_s4 = inlined_call_operand.vmem [shape: f32[1,8], index: 4, kind: input, shape index: {}]   ;;  %s218_s5 = inlined_call_operand.vmem [shape: f32[16,8], index: 5, kind: output, shape index: {}]  }
   0x1   :  { %v25_v0 = vld [vmem:[%s213_s1 + $0x18] sm:$0xff]  ;;  %v24_v1 = vld [vmem:[%s213_s1 + $0x10] sm:$0xff]  ;;  %v23_v2 = vld [vmem:[%s213_s1 + $0x8] sm:$0xff] }
   0x2   :  { %115 = vmatpush.msra.mxu3 %v25_v0  ;;  %49 = vmatpush.msra.mxu0 %v25_v0  ;;  %v69_v3 = vld [vmem:[%s214_s3 + $0x38] sm:$0xff]  ;;  %v68_v4 = vld [vmem:[%s214_s3 + $0x30] sm:$0xff]  ;;  %v22_v5 = vld [vmem:[%s213_s1] sm:$0xff] }
   0x3   :  { %119 = vmatpush.msra.mxu2 %v69_v3  ;;  %89 = vmatpush.msra.mxu1 %v69_v3  ;;  %v21_v6 = vld [vmem:[%s215_s0 + $0x8] sm:$0xff]  ;;  %v20_v7 = vld [vmem:[%s215_s0] sm:$0xff]  ;;  %v65_v10 = vld [vmem:[%s214_s3 + $0x18] sm:$0xff] }
   0x4   :  { %116 = vmatpush.msra.mxu3 %v24_v1  ;;  %50 = vmatpush.msra.mxu0 %v24_v1  ;;  %v67_v8 = vld [vmem:[%s214_s3 + $0x28] sm:$0xff]  ;;  %v66_v9 = vld [vmem:[%s214_s3 + $0x20] sm:$0xff]  ;;  %v64_v11 = vld [vmem:[%s214_s3 + $0x10] sm:$0xff] }
   0x5   :  { %120 = vmatpush.msra.mxu2 %v68_v4  ;;  %90 = vmatpush.msra.mxu1 %v68_v4  ;;  %v63_v12 = vld [vmem:[%s214_s3 + $0x8] sm:$0xff]  ;;  %v62_v13 = vld [vmem:[%s214_s3] sm:$0xff] }
   0x6   :  { %117 = vmatpush.msra.mxu3 %v23_v2  ;;  %51 = vmatpush.msra.mxu0 %v23_v2  ;;  %v127_v14 = vld [vmem:[%s216_s2] ss:$0 sm:$0xff] }
   0x7   :  { %121 = vmatpush.msra.mxu2 %v67_v8  ;;  %91 = vmatpush.msra.mxu1 %v67_v8  ;;  %v128_v21 = vld [vmem:[%s217_s4] ss:$0 sm:$0xff] }
   0x8   :  { %118 = vmatpush.msra.mxu3 %v22_v5  ;;  %52 = vmatpush.msra.mxu0 %v22_v5 }
   0x9   :  { %112 = vmatmul.msk.f32.vlgmr.msra.gmra.mxu3 %vm30_vm0, %v21_v6  ;;  %111 = vmatmul.msk.f32.vlgmr.msra.gmra.mxu0 %vm30_vm0, %v20_v7 }
   0xa   :  { %122 = vmatpush.msra.mxu2 %v66_v9  ;;  %92 = vmatpush.msra.mxu1 %v66_v9 }
   0xc   :  { %123 = vmatpush.msra.mxu2 %v65_v10  ;;  %93 = vmatpush.msra.mxu1 %v65_v10 }
   0xe   :  { %124 = vmatpush.msra.mxu2 %v64_v11  ;;  %94 = vmatpush.msra.mxu1 %v64_v11 }
  0x10   :  { %125 = vmatpush.msra.mxu2 %v63_v12  ;;  %95 = vmatpush.msra.mxu1 %v63_v12 }
  0x12   :  { %126 = vmatpush.msra.mxu2 %v62_v13  ;;  %96 = vmatpush.msra.mxu1 %v62_v13 }
  0x86   :  { %v54_v15 = vpop.f32.mrf.mxu0 }
  0x87   :  { %v55_v16 = vadd.f32 %v127_v14, %v54_v15 }
  0x89   :  { %v60_v17 = vmax.f32 %v55_v16, 0.0 }
  0x8b   :  { %113 = vmatmul.msk.f32.vlgmr.msra.gmra.mxu1 %vm74_vm1, %v60_v17 }
  0x8c   :  { %v57_v18 = vpop.f32.mrf.mxu3 }
  0x8d   :  { %v58_v19 = vadd.f32 %v127_v14, %v57_v18 }
  0x8f   :  { %v61_v20 = vmax.f32 %v58_v19, 0.0 }
  0x91   :  { %114 = vmatmul.msk.f32.vlgmr.msra.gmra.mxu2 %vm74_vm1, %v61_v20 }
 0x108   :  { %v98_v22 = vpop.f32.mrf.mxu1 }
 0x109   :  { %v99_v23 = vadd.f32 %v128_v21, %v98_v22 }
 0x10b   :  { %105 = vst.msk [vmem:[%s218_s5] sm:$0xff] %vm104_vm2, %v99_v23 }
 0x114   :  { %v101_v24 = vpop.f32.mrf.mxu2 }
 0x115   :  { %v102_v25 = vadd.f32 %v128_v21, %v101_v24 }
 0x117   :  { %106 = vst.msk [vmem:[%s218_s5 + $0x8] sm:$0xff] %vm104_vm2, %v102_v25 }

</bundles_post_ra>
